<compile_context>
chip_gen: v7x
topology: tpu7x:2x2x1
jax: 0.10.0
libtpu: 0.0.40
codegen_flags: <defaults>
</compile_context>

<pallas_src>
import functools

import jax
import jax.numpy as jnp
from jax.experimental import pallas as pl
from jax.experimental.pallas import tpu as pltpu


def pitch_predictor_kernel(x_ref, w1_ref, b1_ref, w2_ref, b2_ref, wl_ref, bl_ref, o_ref,
                           *, seq_len):
    """One row block (a whole number of batch elements, flattened on the sublane axis).

    x_ref : (rows, Cin)  f32         w1_ref: (3*Cin, F) bf16   b1_ref: (1, F) f32
    w2_ref: (3*F, F) bf16            b2_ref: (1, F) f32
    wl_ref: (1, F) f32               bl_ref: (1, 1) f32 [SMEM]
    o_ref : (1, rows) f32 (lane-dense)
    """
    rows = x_ref.shape[0]

    # Sequence-edge mask, computed ONCE per tile as (rows, 1) and reused by both convs.
    # Rows are whole batch elements laid out contiguously, so position-in-sequence is
    # simply row % seq_len (blocks always start at a sequence boundary).
    pos = jax.lax.broadcasted_iota(jnp.int32, (rows, 1), 0) % seq_len
    is_seq_start = pos == 0
    is_seq_end = pos == seq_len - 1

    def shifted_taps(h):
        # x[t-1] / x[t+1] with zero padding at every sequence edge (also zeroes the rows
        # that would otherwise pick up a neighboring batch element inside the block).
        zero_row = jnp.zeros_like(h[:1])
        h_prev = jnp.where(is_seq_start, 0.0, jnp.concatenate([zero_row, h[:-1]], axis=0))
        h_next = jnp.where(is_seq_end, 0.0, jnp.concatenate([h[1:], zero_row], axis=0))
        return h_prev, h_next

    def conv_relu(h, w_ref, b_ref):
        # h: (rows, C) f32; w_ref: (3*C, F) bf16; b_ref: (1, F) f32.
        c = h.shape[1]
        h_prev, h_next = shifted_taps(h)
        bf = lambda a: a.astype(jnp.bfloat16)      # bf16 MXU operands, f32 accumulation
        w = w_ref[...]
        if c % 256 == 0:
            # K already a multiple of the MXU K tile: three accumulated dots, no concat temp.
            acc = jnp.dot(bf(h_prev), w[:c], preferred_element_type=jnp.float32)
            acc = acc + jnp.dot(bf(h), w[c:2 * c], preferred_element_type=jnp.float32)
            acc = acc + jnp.dot(bf(h_next), w[2 * c:], preferred_element_type=jnp.float32)
        else:
            # Fused K=3*C single matmul (saves a partial K pass, e.g. C=128 -> K=384).
            h_cat = jnp.concatenate([bf(h_prev), bf(h), bf(h_next)], axis=1)
            acc = jnp.dot(h_cat, w, preferred_element_type=jnp.float32)
        return jnp.maximum(acc + b_ref[...], 0.0)

    x = x_ref[...]                                             # (rows, Cin) f32
    h1 = conv_relu(x, w1_ref, b1_ref)                          # (rows, F)   f32
    h2 = conv_relu(h1, w2_ref, b2_ref)                         # (rows, F)   f32

    # F -> 1 projection on VPU (multiply) + XLU (lane reduce): no N=1 MXU pass.
    y = jnp.sum(h2 * wl_ref[...], axis=-1) + bl_ref[0, 0]      # (rows,)
    o_ref[...] = y[None, :]                                    # lane-dense (1, rows) store


def _elems_per_block(batch, seq_len, target_rows=512):
    """Batch elements per grid step: pack up to ~target_rows rows (fill MXU M) while keeping
    >= 2 grid steps when the batch allows it (v7x has 2 TensorCores)."""
    best = 1
    for d in range(1, batch + 1):
        if batch % d == 0 and d * seq_len <= max(seq_len, target_rows) \
                and (batch // d >= 2 or batch == 1):
            best = d
    return best


def pitch_predictor(x, params):
    B, T, Cin = x.shape
    # Fuse tap weights in the wrapper: (3, C, F) -> (3*C, F), rows = [w[0]; w[1]; w[2]];
    # cast MXU weights to bf16 (accumulation stays f32 in-kernel).
    w1 = params["w1"].reshape(3 * Cin, -1).astype(jnp.bfloat16)
    F = w1.shape[-1]
    w2 = params["w2"].reshape(3 * F, F).astype(jnp.bfloat16)
    b1 = params["b1"].astype(jnp.float32)
    b2 = params["b2"].astype(jnp.float32)
    wl_row = params["wl"].reshape(1, F).astype(jnp.float32)    # VPU projection stays f32
    bl = params["bl"].reshape(1, 1).astype(jnp.float32)

    elems = _elems_per_block(B, T)
    rows_per_block = elems * T                                 # whole batch elements per step
    num_blocks = (B * T) // rows_per_block

    x2d = x.reshape(B * T, Cin).astype(jnp.float32)            # fold batch into the row axis

    kernel = functools.partial(pitch_predictor_kernel, seq_len=T)
    const = lambda arr: pl.BlockSpec(arr.shape, lambda i: (0, 0))   # VMEM-resident weights

    out = pl.pallas_call(
        kernel,
        out_shape=jax.ShapeDtypeStruct((num_blocks, 1, rows_per_block), jnp.float32),
        grid=(num_blocks,),
        in_specs=[
            pl.BlockSpec((rows_per_block, Cin), lambda i: (i, 0)),  # row block per step
            const(w1), const(b1),
            const(w2), const(b2),
            const(wl_row),
            pl.BlockSpec(memory_space=pltpu.MemorySpace.SMEM),      # bl scalar in SMEM
        ],
        out_specs=pl.BlockSpec((None, 1, rows_per_block), lambda i: (i, 0, 0)),
        compiler_params=pltpu.CompilerParams(
            dimension_semantics=("parallel",),                      # shard blocks across TCs
            vmem_limit_bytes=32 * 1024 * 1024,
        ),
    )(x2d, w1, b1, w2, b2, wl_row, bl)
    return out.reshape(B, T)                                        # (B, T)


def ref_forward(x, params):
    """Pure-JAX reference matching the PyTorch forward (channels-last layout, f32 HIGHEST)."""
    hi = jax.lax.Precision.HIGHEST

    def conv_relu(h, w_taps, bias):
        pad = jnp.pad(h, ((0, 0), (1, 1), (0, 0)))
        out = (jnp.matmul(pad[:, :-2], w_taps[0], precision=hi)
               + jnp.matmul(pad[:, 1:-1], w_taps[1], precision=hi)
               + jnp.matmul(pad[:, 2:], w_taps[2], precision=hi)) + bias
        return jax.nn.relu(out)

    h = conv_relu(x, params["w1"], params["b1"])
    h = conv_relu(h, params["w2"], params["b2"])
    return (jnp.matmul(h, params["wl"], precision=hi) + params["bl"][0, 0])[..., 0]


def init_params(key, in_dim, filter_size):
    ks = jax.random.split(key, 6)
    s1 = 1.0 / jnp.sqrt(in_dim * 3.0)
    s2 = 1.0 / jnp.sqrt(filter_size * 3.0)
    sl = 1.0 / jnp.sqrt(float(filter_size))
    return dict(
        # taps-first layout: w[k] = torch_conv_weight[:, :, k].T  -> (3, Cin, Cout)
        w1=jax.random.uniform(ks[0], (3, in_dim, filter_size), jnp.float32, -s1, s1),
        b1=jax.random.uniform(ks[1], (1, filter_size), jnp.float32, -s1, s1),
        w2=jax.random.uniform(ks[2], (3, filter_size, filter_size), jnp.float32, -s2, s2),
        b2=jax.random.uniform(ks[3], (1, filter_size), jnp.float32, -s2, s2),
        wl=jax.random.uniform(ks[4], (filter_size, 1), jnp.float32, -sl, sl),
        bl=jax.random.uniform(ks[5], (1, 1), jnp.float32, -sl, sl),
    )


if __name__ == "__main__":
    key = jax.random.PRNGKey(0)
    kx, kp = jax.random.split(key)

    # Small but lane-aligned channel count (module default is 256).
    B, T, IN_DIM, FILTER = 2, 16, 128, 128
    x = jax.random.normal(kx, (B, T, IN_DIM), dtype=jnp.float32)
    params = init_params(kp, IN_DIM, FILTER)

    out = pitch_predictor(x, params)
    out = jax.block_until_ready(out)

    ref = ref_forward(x, params)
    assert out.shape == (B, T)
    # Kernel uses bf16 MXU operands with f32 accumulation; reference is f32 HIGHEST,
    # so the comparison tolerance is loosened accordingly.
    assert jnp.allclose(out, ref, atol=3e-2, rtol=3e-2), "mismatch vs. JAX reference"

    print("KERNEL_OK")
</pallas_src>

<mosaic_0001>
module attributes {stable_mosaic.version = 11 : i64} {
  func.func @pitch_predictor_kernel(%arg0: i32, %arg1: memref<16x128xf32, #tpu.memory_space<vmem>>, %arg2: memref<384x128xbf16, #tpu.memory_space<vmem>>, %arg3: memref<1x128xf32, #tpu.memory_space<vmem>>, %arg4: memref<384x128xbf16, #tpu.memory_space<vmem>>, %arg5: memref<1x128xf32, #tpu.memory_space<vmem>>, %arg6: memref<1x128xf32, #tpu.memory_space<vmem>>, %arg7: memref<1x1xf32, #tpu.memory_space<smem>>, %arg8: memref<1x1x16xf32, #tpu.memory_space<vmem>>) attributes {dimension_semantics = [#tpu.dimension_semantics<parallel>], iteration_bounds = array<i64: 2>, scalar_prefetch = 0 : i64, scratch_operands = 0 : i64, tpu.core_type = #tpu.core_type<tc>, window_params = [{transform_indices = @transform_0, window_bounds = array<i64: 16, 128>}, {pipeline_mode = #tpu.pipeline_mode<synchronous>, transform_indices = @transform_1, window_bounds = array<i64: 384, 128>}, {pipeline_mode = #tpu.pipeline_mode<synchronous>, transform_indices = @transform_2, window_bounds = array<i64: 1, 128>}, {pipeline_mode = #tpu.pipeline_mode<synchronous>, transform_indices = @transform_3, window_bounds = array<i64: 384, 128>}, {pipeline_mode = #tpu.pipeline_mode<synchronous>, transform_indices = @transform_4, window_bounds = array<i64: 1, 128>}, {pipeline_mode = #tpu.pipeline_mode<synchronous>, transform_indices = @transform_5, window_bounds = array<i64: 1, 128>}, {transform_indices = @transform_6, window_bounds = array<i64: 1, 1>}, {transform_indices = @transform_7, window_bounds = array<i64: 1, 1, 16>}]} {
    %0 = tpu.iota {dimensions = array<i32: 0>} : vector<16x1xi32>
    %c16_i32 = arith.constant 16 : i32
    %c0_i32 = arith.constant 0 : i32
    %1 = arith.cmpi eq, %c16_i32, %c0_i32 : i32
    %c1_i32 = arith.constant 1 : i32
    %2 = arith.select %1, %c1_i32, %c16_i32 : i32
    %3 = vector.broadcast %2 : i32 to vector<16x1xi32>
    %4 = arith.remsi %0, %3 : vector<16x1xi32>
    %c0_i32_0 = arith.constant 0 : i32
    %5 = vector.broadcast %c0_i32_0 : i32 to vector<16x1xi32>
    %6 = arith.cmpi ne, %4, %5 : vector<16x1xi32>
    %c0_i32_1 = arith.constant 0 : i32
    %7 = vector.broadcast %c0_i32_1 : i32 to vector<16x1xi32>
    %8 = arith.cmpi slt, %4, %7 : vector<16x1xi32>
    %c0_i32_2 = arith.constant 0 : i32
    %9 = arith.cmpi slt, %2, %c0_i32_2 : i32
    %10 = vector.broadcast %9 : i1 to vector<16x1xi1>
    %11 = vector.broadcast %10 : vector<16x1xi1> to vector<16x1xi1>
    %12 = arith.xori %8, %11 : vector<16x1xi1>
    %13 = arith.andi %12, %6 : vector<16x1xi1>
    %14 = vector.broadcast %2 : i32 to vector<16x1xi32>
    %15 = arith.addi %4, %14 : vector<16x1xi32>
    %16 = arith.select %13, %15, %4 : vector<16x1xi1>, vector<16x1xi32>
    %c0_i32_3 = arith.constant 0 : i32
    %17 = vector.broadcast %c0_i32_3 : i32 to vector<16x1xi32>
    %18 = arith.cmpi eq, %16, %17 : vector<16x1xi32>
    %c15_i32 = arith.constant 15 : i32
    %19 = vector.broadcast %c15_i32 : i32 to vector<16x1xi32>
    %20 = arith.cmpi eq, %16, %19 : vector<16x1xi32>
    %c0 = arith.constant 0 : index
    %c0_4 = arith.constant 0 : index
    %21 = vector.load %arg1[%c0, %c0_4] : memref<16x128xf32, #tpu.memory_space<vmem>>, vector<16x128xf32>
    %cst = arith.constant 0.000000e+00 : f32
    %22 = vector.broadcast %cst : f32 to vector<1x128xf32>
    %23 = vector.extract_strided_slice %21 {offsets = [0, 0], sizes = [15, 128], strides = [1, 1]} : vector<16x128xf32> to vector<15x128xf32>
    %24 = tpu.concatenate %22, %23 in 0 : vector<1x128xf32>, vector<15x128xf32> -> vector<16x128xf32>
    %cst_5 = arith.constant 0.000000e+00 : f32
    %25 = vector.shape_cast %18 : vector<16x1xi1> to vector<16x1xi1>
    %26 = vector.broadcast %25 : vector<16x1xi1> to vector<16x128xi1>
    %27 = vector.broadcast %cst_5 : f32 to vector<16x128xf32>
    %28 = arith.select %26, %27, %24 : vector<16x128xi1>, vector<16x128xf32>
    %29 = vector.extract_strided_slice %21 {offsets = [1, 0], sizes = [15, 128], strides = [1, 1]} : vector<16x128xf32> to vector<15x128xf32>
    %30 = tpu.concatenate %29, %22 in 0 : vector<15x128xf32>, vector<1x128xf32> -> vector<16x128xf32>
    %cst_6 = arith.constant 0.000000e+00 : f32
    %31 = vector.shape_cast %20 : vector<16x1xi1> to vector<16x1xi1>
    %32 = vector.broadcast %31 : vector<16x1xi1> to vector<16x128xi1>
    %33 = vector.broadcast %cst_6 : f32 to vector<16x128xf32>
    %34 = arith.select %32, %33, %30 : vector<16x128xi1>, vector<16x128xf32>
    %c0_7 = arith.constant 0 : index
    %c0_8 = arith.constant 0 : index
    %35 = vector.load %arg2[%c0_7, %c0_8] : memref<384x128xbf16, #tpu.memory_space<vmem>>, vector<384x128xbf16>
    %36 = arith.truncf %28 : vector<16x128xf32> to vector<16x128xbf16>
    %37 = arith.truncf %21 : vector<16x128xf32> to vector<16x128xbf16>
    %38 = arith.truncf %34 : vector<16x128xf32> to vector<16x128xbf16>
    %39 = tpu.concatenate %36, %37, %38 in 1 : vector<16x128xbf16>, vector<16x128xbf16>, vector<16x128xbf16> -> vector<16x384xbf16>
    %cst_9 = arith.constant dense<0.000000e+00> : vector<16x128xf32>
    %40 = tpu.matmul %39, %35, %cst_9 {dimension_numbers = #tpu.dot_dimension_numbers<[1], [0], [0], [1], [0, 0, 1, 1], [], []>} : vector<16x384xbf16>, vector<384x128xbf16>, vector<16x128xf32> -> vector<16x128xf32>
    %c0_10 = arith.constant 0 : index
    %c0_11 = arith.constant 0 : index
    %41 = vector.load %arg3[%c0_10, %c0_11] : memref<1x128xf32, #tpu.memory_space<vmem>>, vector<1x128xf32>
    %42 = vector.broadcast %41 : vector<1x128xf32> to vector<16x128xf32>
    %43 = arith.addf %40, %42 : vector<16x128xf32>
    %cst_12 = arith.constant 0.000000e+00 : f32
    %44 = vector.broadcast %cst_12 : f32 to vector<16x128xf32>
    %45 = arith.maximumf %43, %44 : vector<16x128xf32>
    %cst_13 = arith.constant 0.000000e+00 : f32
    %46 = vector.broadcast %cst_13 : f32 to vector<1x128xf32>
    %47 = vector.extract_strided_slice %45 {offsets = [0, 0], sizes = [15, 128], strides = [1, 1]} : vector<16x128xf32> to vector<15x128xf32>
    %48 = tpu.concatenate %46, %47 in 0 : vector<1x128xf32>, vector<15x128xf32> -> vector<16x128xf32>
    %cst_14 = arith.constant 0.000000e+00 : f32
    %49 = vector.shape_cast %18 : vector<16x1xi1> to vector<16x1xi1>
    %50 = vector.broadcast %49 : vector<16x1xi1> to vector<16x128xi1>
    %51 = vector.broadcast %cst_14 : f32 to vector<16x128xf32>
    %52 = arith.select %50, %51, %48 : vector<16x128xi1>, vector<16x128xf32>
    %53 = vector.extract_strided_slice %45 {offsets = [1, 0], sizes = [15, 128], strides = [1, 1]} : vector<16x128xf32> to vector<15x128xf32>
    %54 = tpu.concatenate %53, %46 in 0 : vector<15x128xf32>, vector<1x128xf32> -> vector<16x128xf32>
    %cst_15 = arith.constant 0.000000e+00 : f32
    %55 = vector.shape_cast %20 : vector<16x1xi1> to vector<16x1xi1>
    %56 = vector.broadcast %55 : vector<16x1xi1> to vector<16x128xi1>
    %57 = vector.broadcast %cst_15 : f32 to vector<16x128xf32>
    %58 = arith.select %56, %57, %54 : vector<16x128xi1>, vector<16x128xf32>
    %c0_16 = arith.constant 0 : index
    %c0_17 = arith.constant 0 : index
    %59 = vector.load %arg4[%c0_16, %c0_17] : memref<384x128xbf16, #tpu.memory_space<vmem>>, vector<384x128xbf16>
    %60 = arith.truncf %52 : vector<16x128xf32> to vector<16x128xbf16>
    %61 = arith.truncf %45 : vector<16x128xf32> to vector<16x128xbf16>
    %62 = arith.truncf %58 : vector<16x128xf32> to vector<16x128xbf16>
    %63 = tpu.concatenate %60, %61, %62 in 1 : vector<16x128xbf16>, vector<16x128xbf16>, vector<16x128xbf16> -> vector<16x384xbf16>
    %cst_18 = arith.constant dense<0.000000e+00> : vector<16x128xf32>
    %64 = tpu.matmul %63, %59, %cst_18 {dimension_numbers = #tpu.dot_dimension_numbers<[1], [0], [0], [1], [0, 0, 1, 1], [], []>} : vector<16x384xbf16>, vector<384x128xbf16>, vector<16x128xf32> -> vector<16x128xf32>
    %c0_19 = arith.constant 0 : index
    %c0_20 = arith.constant 0 : index
    %65 = vector.load %arg5[%c0_19, %c0_20] : memref<1x128xf32, #tpu.memory_space<vmem>>, vector<1x128xf32>
    %66 = vector.broadcast %65 : vector<1x128xf32> to vector<16x128xf32>
    %67 = arith.addf %64, %66 : vector<16x128xf32>
    %cst_21 = arith.constant 0.000000e+00 : f32
    %68 = vector.broadcast %cst_21 : f32 to vector<16x128xf32>
    %69 = arith.maximumf %67, %68 : vector<16x128xf32>
    %c0_22 = arith.constant 0 : index
    %c0_23 = arith.constant 0 : index
    %70 = vector.load %arg6[%c0_22, %c0_23] : memref<1x128xf32, #tpu.memory_space<vmem>>, vector<1x128xf32>
    %71 = vector.broadcast %70 : vector<1x128xf32> to vector<16x128xf32>
    %72 = arith.mulf %69, %71 : vector<16x128xf32>
    %cst_24 = arith.constant dense<0.000000e+00> : vector<16xf32>
    %73 = vector.multi_reduction <add>, %72, %cst_24 [1] : vector<16x128xf32> to vector<16xf32>
    %c0_25 = arith.constant 0 : index
    %c0_26 = arith.constant 0 : index
    %74 = memref.load %arg7[%c0_25, %c0_26] : memref<1x1xf32, #tpu.memory_space<smem>>
    %75 = vector.broadcast %74 : f32 to vector<16xf32>
    %76 = arith.addf %73, %75 : vector<16xf32>
    %77 = vector.shape_cast %76 : vector<16xf32> to vector<1x16xf32>
    %c0_27 = arith.constant 0 : index
    %c0_28 = arith.constant 0 : index
    %c0_29 = arith.constant 0 : index
    %78 = vector.load %arg8[%c0_27, %c0_28, %c0_29] : memref<1x1x16xf32, #tpu.memory_space<vmem>>, vector<1x1x16xf32>
    %79 = vector.shape_cast %78 : vector<1x1x16xf32> to vector<1x16xf32>
    %80 = vector.shape_cast %77 : vector<1x16xf32> to vector<1x1x16xf32>
    tpu.vector_store %arg8[%c0_27, %c0_28, %c0_29], %80 {strides = array<i32>} : memref<1x1x16xf32, #tpu.memory_space<vmem>>, vector<1x1x16xf32>,
    return
  }
  func.func @transform_0(%arg0: i32) -> (i32, i32) {
    %c0_i32 = arith.constant 0 : i32
    %c0_i32_0 = arith.constant 0 : i32
    return %arg0, %c0_i32 : i32, i32
  }
  func.func @transform_1(%arg0: i32) -> (i32, i32) {
    %c0_i32 = arith.constant 0 : i32
    %c0_i32_0 = arith.constant 0 : i32
    %c0_i32_1 = arith.constant 0 : i32
    return %c0_i32, %c0_i32_0 : i32, i32
  }
  func.func @transform_2(%arg0: i32) -> (i32, i32) {
    %c0_i32 = arith.constant 0 : i32
    %c0_i32_0 = arith.constant 0 : i32
    %c0_i32_1 = arith.constant 0 : i32
    return %c0_i32, %c0_i32_0 : i32, i32
  }
  func.func @transform_3(%arg0: i32) -> (i32, i32) {
    %c0_i32 = arith.constant 0 : i32
    %c0_i32_0 = arith.constant 0 : i32
    %c0_i32_1 = arith.constant 0 : i32
    return %c0_i32, %c0_i32_0 : i32, i32
  }
  func.func @transform_4(%arg0: i32) -> (i32, i32) {
    %c0_i32 = arith.constant 0 : i32
    %c0_i32_0 = arith.constant 0 : i32
    %c0_i32_1 = arith.constant 0 : i32
    return %c0_i32, %c0_i32_0 : i32, i32
  }
  func.func @transform_5(%arg0: i32) -> (i32, i32) {
    %c0_i32 = arith.constant 0 : i32
    %c0_i32_0 = arith.constant 0 : i32
    %c0_i32_1 = arith.constant 0 : i32
    return %c0_i32, %c0_i32_0 : i32, i32
  }
  func.func @transform_6(%arg0: i32) -> (i32, i32) {
    %c0_i32 = arith.constant 0 : i32
    %c0_i32_0 = arith.constant 0 : i32
    %c0_i32_1 = arith.constant 0 : i32
    return %c0_i32, %c0_i32_0 : i32, i32
  }
  func.func @transform_7(%arg0: i32) -> (i32, i32, i32) {
    %c0_i32 = arith.constant 0 : i32
    %c0_i32_0 = arith.constant 0 : i32
    %c0_i32_1 = arith.constant 0 : i32
    return %arg0, %c0_i32, %c0_i32_0 : i32, i32, i32
  }
}

</mosaic_0001>

<bundles_post_ra>
// kernel: tpu_custom_call.1
= control target key start
LH: loop header
LB: loop body
LE: loop exit
PB: predicated region body
PF: predicated region fallthrough
CT: control target
= control target key end

     0   :  { %s1931_s0 = inlined_call_operand.hbm [shape: f32[32,128], index: 0, kind: input, shape index: {}]   ;;  %s1932_s1 = inlined_call_operand.hbm [shape: bf16[384,128], index: 1, kind: input, shape index: {}]   ;;  %s1933_s2 = inlined_call_operand.vmem [shape: f32[1,128], index: 2, kind: input, shape index: {}]   ;;  %s1934_s3 = inlined_call_operand.hbm [shape: bf16[384,128], index: 3, kind: input, shape index: {}]   ;;  %s1935_s4 = inlined_call_operand.vmem [shape: f32[1,128], index: 4, kind: input, shape index: {}]   ;;  %s1936_s5 = inlined_call_operand.vmem [shape: f32[1,128], index: 5, kind: input, shape index: {}]   ;;  %s1937_s6 = inlined_call_operand.<no memory space> [shape: f32[1,1], index: 6, kind: input, shape index: {}]   ;;  %s1938_s7 = inlined_call_operand.hbm [shape: f32[2,1,16], index: 7, kind: output, shape index: {}]  }
   0x1   :  { %12 = sst [smem:[#allocation2]] %s1937_s6 }
   0x2   :  { %13 = vsyncpa [#allocation4], 0 }
   0x3   :  { %15 = vsyncpa [#allocation4 + $0x1], 0 }
   0x4   :  { %16 = vsyncpa [#allocation7], 0 }
   0x5   :  { %17 = vsyncpa [#allocation5], 0 }
   0x6   :  { %19 = vsyncpa [#allocation5 + $0x1], 0  ;;  %s1633_s26 = smov 0   ;;  %s1635_s27 = smov 0  }
   0x7   :  { %s1637_s28 = smov 0   ;;  %s1639_s29 = smov 0  }
   0x8 LB: > { %s1654_s6 = sadd.s32 4294967295, %s1577_s29   ;;  %s1112_s30 = sadd.s32 4294967294, %s1577_s29   ;;  %s1577_s29 = sphi %s1639_s29, %s1962_s29   ;;  %s1573_s28 = sphi %s1637_s28, %s1961_s28   ;;  %s1569_s27 = sphi %s1635_s27, %s1960_s27   ;;  %s1565_s26 = sphi %s1633_s26, %s1959_s26  }
   0x9   : > { %p45_p0 = scmp.ne.s32.totalorder %s1569_s27, %s1565_s26  ;;  %p1939_p1 = scmp.eq.s32.totalorder %s1654_s6, 0 }
   0xa   : > { %p201_p3 = scmp.eq.s32.totalorder %s1112_s30, 1  ;;  %p1113_p5 = scmp.ge.s32.totalorder %s1577_s29, 1 }
   0xb   : > { %p1663_p4 = por %p1939_p1, %p45_p0  ;;  %p208_p7 = scmp.lt.s32.totalorder %s1577_s29, 3 }
   0xc   : > { %p1668_p6 = por %p201_p3, %p45_p0  ;;  %s1579_s11 = smov [#allocation6]  }
   0xd   : > { %s1942_s8 = scalar_select %p1663_p4, 1, 0 }
   0xe   : > { %s1943_s9 = scalar_select %p1668_p6, 1, 0 }
   0xf   : > { %p1673_p8 = pnand %p1113_p5, %p208_p7  ;;  %s220_s12 = sshll.u32 %s1579_s11, 4  ;;  %s1677_s12 = int_to_ptr.vmem [resolvable:$true] %s220_s12 }
  0x10   : > { %s1580_s14 = smov [#allocation8]   ;;  %s1421_s18 = scalar_lea.hbm %s1932_s1, 3072 }
  0x11   : > { %p1311_p9 = pneg %p1673_p8  ;;  %s236_s15 = sshll.u32 %s1580_s14, 4  ;;  %s1688_s15 = int_to_ptr.vmem [resolvable:$true] %s236_s15 }
  0x12   : > { %p1422_p12 = scmp.ne.s32.totalorder %s1932_s1, %s1421_s18  ;;  %p1428_p5 = scmp.lt.u32.totalorder %s1421_s18, %s1932_s1 }
  0x13   : > { %p1684_p11 = pnand %p1311_p9, %p1939_p1 }
  0x15   : > { %p1423_p13 = pneg %p1684_p11 }
  0x17   : > { %p1424_p0 = pnand %p1423_p13, %p1422_p12 }
  0x19   : > { %p1425_p3 = pneg %p1424_p0 }
  0x1b   : > { %p1430_p7 = pnand %p1428_p5, %p1425_p3 }
  0x1d   : > { %1433 = shalt.err (!%p1430_p7)
}
  0x1e   : > { %s1434_s23 = scalar_lea.vmem %s1677_s12, 3072  ;;  %p1442_p2 = scmp.lt.s32.totalorder %s1677_s12, %s1677_s12 }
  0x1f   : > { %p1435_p9 = scmp.ne.s32.totalorder %s1677_s12, %s1434_s23  ;;  %p1443_p12 = scmp.lt.s32.totalorder %s1434_s23, %s1434_s23 }
  0x21   : > { %p1437_p10 = pnand %p1435_p9, %p1423_p13  ;;  %p1444_p0 = por %p1443_p12, %p1442_p2 }
  0x23   : > { %p1438_p1 = pneg %p1437_p10 }
  0x25   : > { %p1445_p6 = pnand %p1444_p0, %p1438_p1 }
  0x27   : > { %1448 = shalt.err (!%p1445_p6)
}
  0x28   : > { %s1581_s24 = smov 64   ;;  %s1582_s25 = smov 4  }
  0x29   : > { %1314 = dma.hbm_to_vmem [thread:$0]  (!%p1684_p11), %s1932_s1, 3072, %s1677_s12, [#allocation7], %s1581_s24, %s1581_s24, %s1582_s25  }
  0x2a   : > { %s1449_s17 = scalar_lea.hbm %s1934_s3, 3072 }
  0x2b   : > { %p1450_p2 = scmp.ne.s32.totalorder %s1934_s3, %s1449_s17  ;;  %p1456_p10 = scmp.lt.u32.totalorder %s1449_s17, %s1934_s3 }
  0x2d   : > { %p1452_p1 = pnand %p1450_p2, %p1423_p13 }
  0x2f   : > { %p1453_p6 = pneg %p1452_p1 }
  0x31   : > { %p1458_p3 = pnand %p1456_p10, %p1453_p6 }
  0x33   : > { %1461 = shalt.err (!%p1458_p3)
}
  0x34   : > { %s1462_s12 = scalar_lea.vmem %s1688_s15, 3072  ;;  %p1470_p12 = scmp.lt.s32.totalorder %s1688_s15, %s1688_s15 }
  0x35   : > { %p1463_p5 = scmp.ne.s32.totalorder %s1688_s15, %s1462_s12  ;;  %p1471_p0 = scmp.lt.s32.totalorder %s1462_s12, %s1462_s12 }
  0x37   : > { %p1465_p7 = pnand %p1463_p5, %p1423_p13  ;;  %p1472_p2 = por %p1471_p0, %p1470_p12 }
  0x39   : > { %p1466_p9 = pneg %p1465_p7 }
  0x3b   : > { %p1473_p1 = pnand %p1472_p2, %p1466_p9 }
  0x3d   : > { %1476 = shalt.err (!%p1473_p1)
}
  0x3e   : > { %1317 = dma.hbm_to_vmem [thread:$0]  (!%p1684_p11), %s1934_s3, 3072, %s1688_s15, [#allocation7], %s1581_s24, %s1581_s24, %s1582_s25  }
  0x3f   : > { %s1743_s30 = sadd.s32 1, %s1577_s29   ;;  %s32_s13 = sadd.s32 1, %s1573_s28 }
  0x40   : > { %s29_s11 = ssub.s32 %s1577_s29, %s1743_s30  ;;  %p39_p13 = scmp.ne.s32.totalorder %s1573_s28, %s1569_s27 }
  0x41   : > { %p30_p6 = scmp.eq.s32.totalorder %s29_s11, 0  ;;  %p40_p10 = scmp.eq.s32.totalorder %s1577_s29, 0 }
  0x42   : > { %p1946_p3 = scmp.eq.s32.totalorder %s1654_s6, 1  ;;  %p1328_p7 = scmp.lt.s32.totalorder %s1577_s29, 2 }
  0x43   : > { %s1759_s16 = scalar_select %p30_p6, %s1573_s28, %s32_s13  }
  0x44   : > { %p1753_p5 = por %p1946_p3, %p39_p13  ;;  %p41_p9 = por %p40_p10, %p39_p13 }
  0x45   : > { %s259_s17 = sand.u32 1, %s1573_s28   ;;  %s1194_s15 = sshll.u32 %s1577_s29, 8 }
  0x46   : > { %s1947_s14 = scalar_select %p1753_p5, 1, 0 }
  0x47   : > { %s1117_s18 = sshll.u32 %s259_s17, 4  ;;  %s1766_s19 = scalar_lea.hbm %s1931_s0, %s1194_s15 }
  0x48   : > { %s263_s20 = scalar_lea.vmem [#allocation3], %s1117_s18  ;;  %p1770_p11 = pnand %p1328_p7, %p41_p9 }
  0x49   : > { %s270_s21 = sshll.u32 %s263_s20, 4  ;;  %s1774_s22 = scalar_lea.sflag [#allocation4], %s259_s17  ;;  %s1768_s21 = int_to_ptr.vmem [resolvable:$true] %s270_s21 }
  0x4a   : > { %s1477_s23 = scalar_lea.hbm %s1766_s19, 256  ;;  %p1479_p0 = pneg %p1770_p11 }
  0x4b   : > { %p1478_p12 = scmp.ne.s32.totalorder %s1766_s19, %s1477_s23  ;;  %s1482_s18 = scalar_lea.hbm %s1931_s0, 512 }
  0x4c   : > { %p1483_p13 = scmp.lt.u32.totalorder %s1766_s19, %s1931_s0  ;;  %p1484_p6 = scmp.lt.u32.totalorder %s1482_s18, %s1477_s23 }
  0x4d   : > { %p1480_p2 = pnand %p1479_p0, %p1478_p12  ;;  %p1486_p3 = scmp.lt.u32.totalorder %s1477_s23, %s1766_s19 }
  0x4e   : > { %p1485_p10 = por %p1484_p6, %p1483_p13 }
  0x4f   : > { %p1481_p1 = pneg %p1480_p2 }
  0x50   : > { %p1487_p7 = por %p1486_p3, %p1485_p10 }
  0x52   : > { %p1488_p9 = pnand %p1487_p7, %p1481_p1 }
  0x54   : > { %1491 = shalt.err (!%p1488_p9)
}
  0x55   : > { %s1492_s17 = scalar_lea.vmem %s1768_s21, 256  ;;  %s1583_s25 = smov [#allocation3]  }
  0x56   : > { %p1493_p12 = scmp.ne.s32.totalorder %s1768_s21, %s1492_s17  ;;  %s1497_s20 = sshll.u32 %s1583_s25, 4  ;;  %s1498_s20 = int_to_ptr.vmem [resolvable:$false] %s1497_s20 }
  0x57   : > { %s1499_s13 = scalar_lea.vmem %s1498_s20, 512  ;;  %p1500_p4 = scmp.lt.s32.totalorder %s1768_s21, %s1498_s20 }
  0x58   : > { %p1495_p2 = pnand %p1493_p12, %p1479_p0  ;;  %p1501_p13 = scmp.lt.s32.totalorder %s1499_s13, %s1492_s17 }
  0x5a   : > { %p1496_p5 = pneg %p1495_p2  ;;  %p1502_p6 = por %p1501_p13, %p1500_p4 }
  0x5c   : > { %p1503_p10 = pnand %p1502_p6, %p1496_p5 }
  0x5e   : > { %1506 = shalt.err (!%p1503_p10)
}
  0x5f   : > { %s1584_s23 = smov 128   ;;  %s1585_s11 = smov 8  }
  0x60   : > { %1321 = dma.hbm_to_vmem [thread:$0]  (!%p1770_p11), %s1766_s19, 256, %s1768_s21, %s1774_s22, %s1584_s23, %s1584_s23, %s1585_s11  }
  0x61   : > { %282 = sbr.rel (%p1673_p8) target bundleno = 758 (0x2f6), region = 48  ;;  %s1805_s18 = sand.u32 (!%p1673_p8), 1, %s1569_s27  }
  0x62   : > { %s1121_s15 = sshll.u32 (!%p1673_p8), %s1805_s18, 4  ;;  %s285_s24 = scalar_lea.sflag (!%p1673_p8), [#allocation4], %s1805_s18 }
  0x63   : > { %s1809_s17 = scalar_lea.vmem (!%p1673_p8), [#allocation3], %s1121_s15  ;;  %p1949_p4 = scmp.ne.s32.totalorder (!%p1673_p8), %s1942_s8, 0 }
  0x68   : > { %1552 = dma.done.wait (%p1949_p4), %s285_s24, 256  }
  0x69   : > { %1554 = vsyncadd (%p1949_p4), %s285_s24, 4294967040  ;;  %p1950_p5 = scmp.eq.s32.totalorder %s1654_s6, 0 }
  0x6b   : > { %1556 = dma.done.wait (%p1950_p5), [#allocation7], 6144   ;;  %p1951_p8 = pmov %p1950_p5 }
  0x6c   : > { %v1586_v0 = vmov 0.0   ;;  %vm1587_vm0 = vmmov 0   ;;  %v1373_v1 = vld [vmem:[#allocation6 + $0x40] sm:$0xff]   ;;  %v1376_v4 = vld [vmem:[#allocation6 + $0x48] sm:$0xff]   ;;  %v1379_v7 = vld [vmem:[#allocation6 + $0x50] sm:$0xff]   ;;  %v328_v12 = vlaneseq  ;;  %vm363_vm1 = vcmask 1040384  }
  0x6d   : > { %1558 = vsyncadd (%p1951_p8), [#allocation7], 4294961152  ;;  %1259 = vmatprep.subr.bf16.mxu1 %v1586_v0  ;;  %1275 = vmatprep.mubr.msk.bf16.mxu1 %vm1587_vm0, %v1586_v0  ;;  %v1374_v2 = vld [vmem:[#allocation6] sm:$0xff]   ;;  %v1377_v5 = vld [vmem:[#allocation6 + $0x8] sm:$0xff]   ;;  %vm376_vm3 = vcmask 1046528   ;;  %vm1588_vm4 = vmmov 1  }
  0x6e   : > { %1197 = vmatprep.subr.bf16.mxu0 %v1373_v1  ;;  %v1375_v3 = vld [vmem:[#allocation6 + $0x80] sm:$0xff]   ;;  %v1378_v6 = vld [vmem:[#allocation6 + $0x88] sm:$0xff]   ;;  %v1380_v8 = vld [vmem:[#allocation6 + $0x10] sm:$0xff]   ;;  %v1826_v16 = vshrl.u32 %v328_v12, 7  ;;  %s992_s25 = sld [smem:[#allocation2]]  ;;  %s1191_s20 = sshll.u32 %s1654_s6, 4 }
  0x6f   : > { %1198 = vmatpush3.bf16.msra.mxu0 %v1374_v2  ;;  %1260 = vmatpush3.bf16.msra.mxu1 %v1375_v3  ;;  %v1381_v9 = vld [vmem:[#allocation6 + $0x90] sm:$0xff]   ;;  %v1382_v10 = vld [vmem:[#allocation6 + $0x58] sm:$0xff]   ;;  %v1385_v14 = vld [vmem:[#allocation6 + $0x60] sm:$0xff]   ;;  %s325_s13 = scalar_lea.vmem [#allocation9], %s1805_s18  ;;  %vm1009_vm8 = vcmask 130112   ;;  %vm1012_vm9 = vcmask 122880   ;;  %s1887_s24 = scalar_lea.hbm %s1938_s7, %s1191_s20 }
  0x70   : > { %1199 = vmatprep.subr.bf16.mxu0 %v1376_v4  ;;  %1261 = vmatprep.subr.bf16.mxu1 %v1586_v0  ;;  %v1383_v11 = vld [vmem:[#allocation6 + $0x18] sm:$0xff]   ;;  %v1386_v15 = vld [vmem:[#allocation6 + $0x20] sm:$0xff]   ;;  %v1388_v18 = vld [vmem:[#allocation6 + $0x68] sm:$0xff]   ;;  %v330_v20 = vadd.s32 8, %v1826_v16  ;;  %v335_v22 = vand.u32 15, %v1826_v16  ;;  %s1027_s23 = sshll.u32 %s325_s13, 4  ;;  %s1889_s23 = int_to_ptr.vmem [resolvable:$true] %s1027_s23 }
  0x71   : > { %v1384_v13 = vld [vmem:[#allocation6 + $0x98] sm:$0xff]   ;;  %v1387_v17 = vld [vmem:[#allocation6 + $0xa0] sm:$0xff]   ;;  %v1389_v19 = vld [vmem:[#allocation6 + $0x28] sm:$0xff]   ;;  %s1507_s6 = scalar_lea.vmem %s1889_s23, 16  ;;  %p1956_p0 = scmp.ne.s32.totalorder %s1947_s14, 0 }
  0x72   : > { %v1390_v21 = vld [vmem:[#allocation6 + $0xa8] sm:$0xff]   ;;  %v1391_v23 = vld [vmem:[#allocation6 + $0x70] sm:$0xff]   ;;  %v1394_v26 = vld [vmem:[#allocation6 + $0x78] sm:$0xff]   ;;  %v342_v27 = vand.u32 15, %v330_v20  ;;  %vm1195_vm2 = vcmp.ne.s32.totalorder %v335_v22, 0  ;;  %p1508_p11 = scmp.ne.s32.totalorder %s1889_s23, %s1507_s6  ;;  %s1589_s8 = smov [#allocation9]  }
  0x73   : > { %1200 = vmatpush3.bf16.msra.mxu0 %v1377_v5  ;;  %1262 = vmatpush3.bf16.msra.mxu1 %v1378_v6  ;;  %v1392_v24 = vld [vmem:[#allocation6 + $0x30] sm:$0xff]   ;;  %v360_v29 = vld [vmem:[%s1809_s17 + $0x8] sm:$0xff]  ;;  %vm1836_vm5 = vmpackc.low %vm1588_vm4, %vm1195_vm2  ;;  %s1511_s10 = sshll.u32 %s1589_s8, 4  ;;  %s1512_s10 = int_to_ptr.vmem [resolvable:$false] %s1511_s10 }
  0x74   : > { %1201 = vmatprep.subr.bf16.mxu0 %v1379_v7  ;;  %1263 = vmatprep.subr.bf16.mxu1 %v1586_v0  ;;  %v1393_v25 = vld [vmem:[#allocation6 + $0xb0] sm:$0xff]   ;;  %v365_v31 = vrot.slane %v360_v29, 7  ;;  %v378_v33 = vrot.slane %v360_v29, 1  ;;  %v1395_v34 = vld [vmem:[#allocation6 + $0x38] sm:$0xff]   ;;  %vm1196_vm6 = vcmp.ne.s32.totalorder %v342_v27, 15  ;;  %v1397_v42 = vld [vmem:[#allocation8 + $0x40] sm:$0xff]   ;;  %p1509_p1 = pnand %p1508_p11, %p1956_p0  ;;  %p1514_p7 = scmp.lt.s32.totalorder %s1889_s23, %s1512_s10 }
  0x75   : > { %v359_v28 = vld [vmem:[%s1809_s17] sm:$0xff]  ;;  %v1396_v37 = vld [vmem:[#allocation6 + $0xb8] sm:$0xff]   ;;  %vm1844_vm7 = vmpackc.low %vm1196_vm6, %vm1588_vm4  ;;  %s1015_s17 = scalar_lea.sflag [#allocation5], %s1805_s18  ;;  %s1513_s19 = scalar_lea.vmem %s1512_s10, 32 }
  0x76   : > { %v364_v30 = vrot.slane %v359_v28, 7  ;;  %v377_v32 = vrot.slane %v359_v28, 1  ;;  %v438_v35 = vpack.c.bf16 %v360_v29, %v359_v28  ;;  %v382_v40 = vsel %vm376_vm3, %v378_v33, 0.0  ;;  %v1398_v45 = vld [vmem:[#allocation8] sm:$0xff]   ;;  %v1400_v48 = vld [vmem:[#allocation8 + $0x48] sm:$0xff]   ;;  %v1403_v51 = vld [vmem:[#allocation8 + $0x50] sm:$0xff]   ;;  %p1510_p3 = pneg %p1509_p1  ;;  %p1515_p9 = scmp.lt.s32.totalorder %s1513_s19, %s1507_s6 }
  0x77   : > { %1202 = vmatpush3.bf16.msra.mxu0 %v1380_v8  ;;  %1264 = vmatpush3.bf16.msra.mxu1 %v1381_v9  ;;  %v1399_v47 = vld [vmem:[#allocation8 + $0x80] sm:$0xff]   ;;  %v1401_v49 = vld [vmem:[#allocation8 + $0x8] sm:$0xff]   ;;  %v1404_v52 = vld [vmem:[#allocation8 + $0x10] sm:$0xff]  }
  0x78   : > { %1203 = vmatprep.subr.bf16.mxu0 %v1382_v10  ;;  %1265 = vmatprep.subr.bf16.mxu1 %v1586_v0  ;;  %v369_v36 = vsel %vm363_vm1, 0.0, %v364_v30  ;;  %v366_v39 = vsel %vm363_vm1, %v364_v30, %v365_v31  ;;  %v379_v41 = vsel %vm376_vm3, %v377_v32, %v378_v33  ;;  %v1402_v50 = vld [vmem:[#allocation8 + $0x88] sm:$0xff]   ;;  %v1405_v53 = vld [vmem:[#allocation8 + $0x90] sm:$0xff]   ;;  %v1406_v54 = vld [vmem:[#allocation8 + $0x58] sm:$0xff]   ;;  %p1516_p12 = por %p1515_p9, %p1514_p7 }
  0x79   : > { %623 = vmatprep.mubr.bf16.mxu0 %v438_v35  ;;  %v1151_v44 = vpack.c.bf16 %v366_v39, %v369_v36  ;;  %v1155_v46 = vpack.c.bf16 %v382_v40, %v379_v41  ;;  %v1407_v55 = vld [vmem:[#allocation8 + $0x18] sm:$0xff]   ;;  %v1409_v57 = vld [vmem:[#allocation8 + $0x60] sm:$0xff]   ;;  %v1412_v60 = vld [vmem:[#allocation8 + $0x68] sm:$0xff]  }
  0x7a   : > { %v1408_v56 = vld [vmem:[#allocation8 + $0x98] sm:$0xff]   ;;  %v1410_v58 = vld [vmem:[#allocation8 + $0x20] sm:$0xff]   ;;  %v1413_v61 = vld [vmem:[#allocation8 + $0x28] sm:$0xff]   ;;  %p1517_p2 = pnand %p1516_p12, %p1510_p3 }
  0x7b   : > { %1204 = vmatpush3.bf16.msra.mxu0 %v1383_v11  ;;  %1266 = vmatpush3.bf16.msra.mxu1 %v1384_v13  ;;  %v1411_v59 = vld [vmem:[#allocation8 + $0xa0] sm:$0xff]   ;;  %v1414_v62 = vld [vmem:[#allocation8 + $0xa8] sm:$0xff]   ;;  %v1415_v63 = vld [vmem:[#allocation8 + $0x70] sm:$0xff]  }
  0x7c   : > { %1205 = vmatprep.subr.bf16.mxu0 %v1385_v14  ;;  %1267 = vmatprep.subr.bf16.mxu1 %v1586_v0  ;;  %v1416_v1 = vld [vmem:[#allocation8 + $0x30] sm:$0xff]   ;;  %v1418_v3 = vld [vmem:[#allocation8 + $0x78] sm:$0xff]   ;;  %v1124_v8 = vld [vmem:[%s1933_s2] ss:$0 sm:$0xff] }
  0x7d   : > { %v1417_v2 = vld [vmem:[#allocation8 + $0xb0] sm:$0xff]   ;;  %v1419_v4 = vld [vmem:[#allocation8 + $0x38] sm:$0xff]   ;;  %v1190_v43 = vld [vmem:[%s1936_s5] ss:$0 sm:$0xff] }
  0x7e   : > { %v1420_v5 = vld [vmem:[#allocation8 + $0xb8] sm:$0xff]  }
  0x7f   : > { %1206 = vmatpush3.bf16.msra.mxu0 %v1386_v15  ;;  %1268 = vmatpush3.bf16.msra.mxu1 %v1387_v17 }
  0x80   : > { %1207 = vmatprep.subr.bf16.mxu0 %v1388_v18  ;;  %1269 = vmatprep.subr.bf16.mxu1 %v1586_v0 }
  0x83   : > { %1208 = vmatpush3.bf16.msra.mxu0 %v1389_v19  ;;  %1270 = vmatpush3.bf16.msra.mxu1 %v1390_v21 }
  0x84   : > { %1209 = vmatprep.subr.bf16.mxu0 %v1391_v23  ;;  %1271 = vmatprep.subr.bf16.mxu1 %v1586_v0 }
  0x87   : > { %1210 = vmatpush3.bf16.msra.mxu0 %v1392_v24  ;;  %1272 = vmatpush3.bf16.msra.mxu1 %v1393_v25 }
  0x88   : > { %1211 = vmatprep.subr.bf16.mxu0 %v1394_v26  ;;  %1273 = vmatprep.subr.bf16.mxu1 %v1586_v0 }
  0x8b   : > { %1212 = vmatpush3.bf16.msra.mxu0 %v1395_v34  ;;  %1274 = vmatpush3.bf16.msra.mxu1 %v1396_v37  ;;  %v1157_v37 = vld [vmem:[%s1935_s4] ss:$0 sm:$0xff] }
  0x8c   : > { %1228 = vmatprep.subr.bf16.mxu0 %v1397_v42  ;;  %1279 = vmatprep.subr.bf16.mxu1 %v1586_v0 }
  0x8e   : > { %1152 = vmatmul.mubr.msk.bf16.vlgmr.msra.gmra.mrb[0].mxu0 %vm1836_vm5, %v1151_v44  ;;  %1276 = vmatmul.mubr.msk.bf16.vlgmr.msra.gmra.mrb[0].mxu1 %vm1844_vm7, %v1155_v46 }
  0x8f   : > { %1229 = vmatpush3.bf16.msra.mxu0 %v1398_v45  ;;  %1280 = vmatpush3.bf16.msra.mxu1 %v1399_v47 }
  0x90   : > { %1230 = vmatprep.subr.bf16.mxu0 %v1400_v48  ;;  %1281 = vmatprep.subr.bf16.mxu1 %v1586_v0 }
  0x91   : > { %1295 = vmatprep.mubr.msk.bf16.mxu1 %vm1587_vm0, %v1586_v0 }
  0x93   : > { %1231 = vmatpush3.bf16.msra.mxu0 %v1401_v49  ;;  %1282 = vmatpush3.bf16.msra.mxu1 %v1402_v50 }
  0x94   : > { %1232 = vmatprep.subr.bf16.mxu0 %v1403_v51  ;;  %1283 = vmatprep.subr.bf16.mxu1 %v1586_v0 }
  0x97   : > { %1233 = vmatpush3.bf16.msra.mxu0 %v1404_v52  ;;  %1284 = vmatpush3.bf16.msra.mxu1 %v1405_v53 }
  0x98   : > { %1234 = vmatprep.subr.bf16.mxu0 %v1406_v54  ;;  %1285 = vmatprep.subr.bf16.mxu1 %v1586_v0 }
  0x9b   : > { %1235 = vmatpush3.bf16.msra.mxu0 %v1407_v55  ;;  %1286 = vmatpush3.bf16.msra.mxu1 %v1408_v56  ;;  %v999_v55 = vand.u32 127, %v328_v12 }
  0x9c   : > { %1287 = vmatprep.subr.bf16.mxu1 %v1586_v0  ;;  %1236 = vmatprep.subr.bf16.mxu0 %v1409_v57  ;;  %v993_v57 = vstv %s992_s25 }
  0x9d   : > { %v1004_v56 = vadd.s32 4294967288, %v999_v55 }
  0x9f   : > { %1237 = vmatpush3.bf16.msra.mxu0 %v1410_v58  ;;  %1288 = vmatpush3.bf16.msra.mxu1 %v1411_v59  ;;  %v1002_v59 = vsub.s32 %v999_v55, %v1826_v16 }
  0xa0   : > { %1289 = vmatprep.subr.bf16.mxu1 %v1586_v0  ;;  %1238 = vmatprep.subr.bf16.mxu0 %v1412_v60 }
  0xa3   : > { %1239 = vmatpush3.bf16.msra.mxu0 %v1413_v61  ;;  %1290 = vmatpush3.bf16.msra.mxu1 %v1414_v62  ;;  %v1007_v61 = vsub.s32 %v1004_v56, %v1826_v16 }
  0xa4   : > { %1291 = vmatprep.subr.bf16.mxu1 %v1586_v0  ;;  %1240 = vmatprep.subr.bf16.mxu0 %v1415_v63 }
  0xa7   : > { %1241 = vmatpush3.bf16.msra.mxu0 %v1416_v1  ;;  %1292 = vmatpush3.bf16.msra.mxu1 %v1417_v2 }
  0xa8   : > { %1293 = vmatprep.subr.bf16.mxu1 %v1586_v0  ;;  %1242 = vmatprep.subr.bf16.mxu0 %v1418_v3 }
  0xab   : > { %1243 = vmatpush3.bf16.msra.mxu0 %v1419_v4  ;;  %1294 = vmatpush3.bf16.msra.mxu1 %v1420_v5 }
 0x161   : > { %v1213_v6 = vpop.f32.mrb[0].mxu0  ;;  %v666_v9 = vpop.f32.mrb[0].mxu1 }
 0x162   : > { %v1214_v7 = vpop.f32.mrb[1].mxu0  ;;  %v1277_v13 = vpop.f32.mrb[1].mxu1 }
 0x163   : > { %v1215_v10 = vadd.f32 %v1214_v7, %v1213_v6  ;;  %v1216_v11 = vpop.f32.mrb[2].mxu0  ;;  %v669_v15 = vpop.f32.mrb[2].mxu1 }
 0x164   : > { %v1217_v14 = vpop.f32.mrb[3].mxu0  ;;  %v1278_v0 = vpop.f32.mrb[3].mxu1 }
 0x165   : > { %v626_v17 = vadd.f32 %v1215_v10, %v1124_v8  ;;  %v1218_v18 = vadd.f32 %v1217_v14, %v1216_v11 }
 0x167   : > { %v667_v19 = vadd.f32 %v666_v9, %v626_v17  ;;  %v629_v20 = vadd.f32 %v1218_v18, %v1124_v8 }
 0x169   : > { %v673_v21 = vmax.f32 %v667_v19, 0.0  ;;  %v670_v22 = vadd.f32 %v669_v15, %v629_v20 }
 0x16b   : > { %v677_v23 = vrot.slane %v673_v21, 7  ;;  %v674_v24 = vmax.f32 %v670_v22, 0.0  ;;  %v685_v25 = vrot.slane %v673_v21, 1 }
 0x16d   : > { %v678_v26 = vrot.slane %v674_v24, 7  ;;  %v686_v27 = vrot.slane %v674_v24, 1  ;;  %v742_v28 = vpack.c.bf16 %v674_v24, %v673_v21  ;;  %v682_v29 = vsel %vm363_vm1, 0.0, %v677_v23 }
 0x16f   : > { %v679_v30 = vsel %vm363_vm1, %v677_v23, %v678_v26  ;;  %v687_v31 = vsel %vm376_vm3, %v685_v25, %v686_v27  ;;  %v690_v32 = vsel %vm376_vm3, %v686_v27, 0.0  ;;  %927 = vmatprep.mubr.bf16.mxu0 %v742_v28 }
 0x170   : > { %v1184_v33 = vpack.c.bf16 %v679_v30, %v682_v29  ;;  %v1188_v34 = vpack.c.bf16 %v690_v32, %v687_v31 }
 0x172   : > { %1185 = vmatmul.mubr.msk.bf16.vlgmr.msra.gmra.mrb[4].mxu0 %vm1836_vm5, %v1184_v33  ;;  %1296 = vmatmul.mubr.msk.bf16.vlgmr.msra.gmra.mrb[4].mxu1 %vm1844_vm7, %v1188_v34 }
 0x245   : > { %v1244_v35 = vpop.f32.mrb[4].mxu0  ;;  %v970_v36 = vpop.f32.mrb[4].mxu1 }
 0x246   : > { %v1245_v39 = vpop.f32.mrb[5].mxu0  ;;  %v1297_v40 = vpop.f32.mrb[5].mxu1 }
 0x247   : > { %v1246_v41 = vadd.f32 %v1245_v39, %v1244_v35  ;;  %v1247_v42 = vpop.f32.mrb[6].mxu0  ;;  %v973_v44 = vpop.f32.mrb[6].mxu1 }
 0x248   : > { %v1248_v45 = vpop.f32.mrb[7].mxu0  ;;  %v1298_v46 = vpop.f32.mrb[7].mxu1 }
 0x249   : > { %v930_v47 = vadd.f32 %v1246_v41, %v1157_v37  ;;  %v1249_v48 = vadd.f32 %v1248_v45, %v1247_v42 }
 0x24b   : > { %v933_v38 = vadd.f32 %v1249_v48, %v1157_v37  ;;  %v971_v49 = vadd.f32 %v970_v36, %v930_v47 }
 0x24d   : > { %v977_v50 = vmax.f32 %v971_v49, 0.0  ;;  %v974_v51 = vadd.f32 %v973_v44, %v933_v38 }
 0x24f   : > { %v986_v52 = vmul.f32 %v1190_v43, %v977_v50  ;;  %v978_v53 = vmax.f32 %v974_v51, 0.0 }
 0x251   : > { %988 = vadd.xlane.f32.xlu0 %v986_v52  ;;  %v987_v54 = vmul.f32 %v1190_v43, %v978_v53 }
 0x255   : > { %990 = vadd.xlane.f32.xlu0 %v987_v54 }
 0x2de   : > { %v989_v58 = vpop.xlane.xlu0 %988 }
 0x2df   : > { %v994_v60 = vadd.f32 %v993_v57, %v989_v58 }
 0x2e1   : > { %v1003_v1 = vrot.slane %v994_v60, %v1002_v59 }
 0x2e2   : > { %v991_v62 = vpop.xlane.xlu0 %990 }
 0x2e3   : > { %v995_v63 = vadd.f32 %v993_v57, %v991_v62 }
 0x2e5   : > { %v1008_v2 = vrot.slane %v995_v63, %v1007_v61 }
 0x2e7   : > { %v1010_v12 = vsel %vm1009_vm8, %v1008_v2, %v1003_v1 }
 0x2e8   : > { %1013 = vst.msk [vmem:[%s325_s13] sm:$0x1] %vm1012_vm9, %v1010_v12 }
 0x2e9   : > { %1520 = shalt.err (!%p1517_p2)
}
 0x2ea   : > { %s1521_s18 = scalar_lea.hbm %s1887_s24, 16  ;;  %s1525_s22 = scalar_lea.hbm %s1938_s7, 32 }
 0x2eb   : > { %p1522_p13 = scmp.ne.s32.totalorder %s1887_s24, %s1521_s18  ;;  %p1526_p4 = scmp.lt.u32.totalorder %s1887_s24, %s1938_s7 }
 0x2ec   : > { %p1527_p5 = scmp.lt.u32.totalorder %s1525_s22, %s1521_s18  ;;  %p1529_p11 = scmp.lt.u32.totalorder %s1521_s18, %s1887_s24 }
 0x2ed   : > { %p1523_p6 = pnand %p1522_p13, %p1956_p0 }
 0x2ee   : > { %p1528_p8 = por %p1527_p5, %p1526_p4 }
 0x2ef   : > { %p1524_p10 = pneg %p1523_p6 }
 0x2f0   : > { %p1530_p1 = por %p1529_p11, %p1528_p8 }
 0x2f2   : > { %p1531_p3 = pnand %p1530_p1, %p1524_p10 }
 0x2f4   : > { %1534 = shalt.err (!%p1531_p3)
}
 0x2f5   : > { %1309 = dma.vmem_to_hbm [thread:$0]  (%p1956_p0), %s1889_s23, 16, %s1887_s24, %s1015_s17  }
 0x2f6 PF: > { %s1039_s13 = sand.u32 1, %s1565_s26   ;;  %p1957_p7 = scmp.ne.s32.totalorder %s1943_s9, 0 }
 0x2f7   : > { %p1958_p9 = scmp.ge.s32.totalorder %s1577_s29, 2  ;;  %s1040_s11 = scalar_lea.sflag [#allocation5], %s1039_s13 }
 0x2f9   : > { %p1323_p12 = pnand %p1958_p9, %p1957_p7 }
 0x2fb   : > { %1560 = dma.done.wait (!%p1323_p12), %s1040_s11, 16  }
 0x2fc   : > { %1562 = vsyncadd (!%p1323_p12), %s1040_s11, 4294967280  ;;  %p22_p2 = scmp.ge.s32.totalorder %s1743_s30, 4   ;;  %s1959_s26 = smov %s1569_s27 }
 0x2fd   : > { %s1960_s27 = smov %s1573_s28  ;;  %s1961_s28 = smov %s1759_s16 }
 0x2fe   : > { %s1962_s29 = smov %s1743_s30  ;;  %24 = sbr.rel (!%p22_p2) target bundleno = 8 (0x8), region = 101 }
 0x305   :  { %1044 = vsyncpa [#allocation4], 1 }
 0x306   :  { %1046 = vsyncpa [#allocation4 + $0x1], 1 }
 0x307   :  { %1047 = vsyncpa [#allocation7], 1 }
 0x308   :  { %1048 = vsyncpa [#allocation5], 1 }
 0x309   :  { %1050 = vsyncpa [#allocation5 + $0x1], 1 }

</bundles_post_ra>
